<compile_context>
chip_gen: v5e
topology: v5e:2x2
jax: 0.10.0
libtpu: 0.0.40
codegen_flags: <defaults>
</compile_context>

<pallas_src>
import functools

import jax
import jax.numpy as jnp
from jax.experimental import pallas as pl
from jax.experimental.pallas import tpu as pltpu
import numpy as np


def _round_up(x, m):
    return (x + m - 1) // m * m


def _mm_attention_kernel(x_ref, w_ref, b_ref, joint_ref, sq_ref, *,
                         channels, n_valid):
    """One module instance per grid step.

    x_ref:     (Np, L) f32; rows [0:n_valid) hold [img | ph | shared | 0-pad] lanes
    w_ref:     (L, L)  f32 block-diag [W_img.T | W_ph.T | W_sh.T], zero-padded
    b_ref:     (1, L)  f32 packed biases, zero-padded
    joint_ref: (Np, L) f32; lanes [0:C) of rows [0:n_valid) hold joint_embed
    sq_ref:    (1, L)  f32 per-lane column sums of att*att (padded rows masked)
    """
    C = channels
    L = x_ref.shape[-1]

    x = x_ref[...]
    # One fused MXU pass for the three Linear branches (block-diag weight),
    # f32 operands / f32 accumulation, then bias + tanh on the VPU/EUP.
    att = jnp.tanh(
        jnp.dot(x, w_ref[...],
                preferred_element_type=jnp.float32,
                precision=jax.lax.Precision.HIGHEST)
        + b_ref[...])                     # (Np, L): [img_att | ph_att | sh_att | 0]

    # joint = img_att*img + ph_att*ph + sh_att*shared : elementwise in the packed
    # layout, then fold the three C-wide lane blocks with XLU lane rolls so the
    # store stays a full lane-dense slab (wrapper slices [:, :C]).
    prod = att * x
    folded = (prod
              + pltpu.roll(prod, L - C, axis=1)
              + pltpu.roll(prod, L - 2 * C, axis=1))
    joint_ref[...] = folded.astype(joint_ref.dtype)

    # trace(A @ A.T) == sum(A * A): one sublane reduction; per-branch block sums
    # and the 2-way scalar softmax are done in the JAX wrapper.
    sq = att * att
    if n_valid < sq.shape[0]:             # zero-padded rows have att = tanh(b) != 0
        rows = jax.lax.broadcasted_iota(jnp.int32, sq.shape, 0)
        sq = jnp.where(rows < n_valid, sq, 0.0)
    sq_ref[...] = jnp.sum(sq, axis=0, keepdims=True)


def pack_mm_attention_params(params):
    """Pack the six Linear params into (block-diag weight, bias row), padded to a
    lane multiple of 128.  Do this once per parameter update, not per forward."""
    w_sh, b_sh, w_img, b_img, w_ph, b_ph = params
    C = w_sh.shape[0]
    L = _round_up(3 * C, 128)
    w_blk = jnp.zeros((L, L), jnp.float32)
    w_blk = w_blk.at[0:C, 0:C].set(w_img.T.astype(jnp.float32))
    w_blk = w_blk.at[C:2 * C, C:2 * C].set(w_ph.T.astype(jnp.float32))
    w_blk = w_blk.at[2 * C:3 * C, 2 * C:3 * C].set(w_sh.T.astype(jnp.float32))
    b_cat = jnp.zeros((1, L), jnp.float32)
    b_cat = b_cat.at[0, 0:C].set(b_img)
    b_cat = b_cat.at[0, C:2 * C].set(b_ph)
    b_cat = b_cat.at[0, 2 * C:3 * C].set(b_sh)
    return w_blk, b_cat


def multimodal_attention_batched(img_embed, ph_embed, packed_params):
    """Batched forward: img_embed, ph_embed are (B, N, C).
    Returns (joint (B, N, C), img_weight (B,), ph_weight (B,))."""
    w_blk, b_cat = packed_params
    B, N, C = img_embed.shape
    L = w_blk.shape[0]
    Np = _round_up(N, 8)

    shared = 0.5 * (img_embed + ph_embed)
    x = jnp.concatenate([img_embed, ph_embed, shared], axis=-1).astype(jnp.float32)
    x = jnp.pad(x, ((0, 0), (0, Np - N), (0, L - 3 * C)))          # (B, Np, L)

    kernel = functools.partial(_mm_attention_kernel, channels=C, n_valid=N)
    cost = pl.CostEstimate(
        flops=int(B * (2 * Np * L * L + 6 * Np * L)),
        transcendentals=int(B * Np * L),
        bytes_accessed=int(4 * (x.size + w_blk.size + b_cat.size
                                + B * Np * L + B * L)))

    joint_pad, sq = pl.pallas_call(
        kernel,
        out_shape=(jax.ShapeDtypeStruct((B, Np, L), jnp.float32),
                   jax.ShapeDtypeStruct((B, 1, L), jnp.float32)),
        grid=(B,),
        in_specs=[pl.BlockSpec((None, Np, L), lambda b: (b, 0, 0)),
                  pl.BlockSpec((L, L), lambda b: (0, 0)),      # weight resident
                  pl.BlockSpec((1, L), lambda b: (0, 0))],     # bias resident
        out_specs=(pl.BlockSpec((None, Np, L), lambda b: (b, 0, 0)),
                   pl.BlockSpec((None, 1, L), lambda b: (b, 0, 0))),
        compiler_params=pltpu.CompilerParams(
            dimension_semantics=("parallel",)),
        cost_estimate=cost,
    )(x, w_blk, b_cat)

    joint = joint_pad[:, :N, :C]
    sq = sq[:, 0, :]                                               # (B, L)
    img_sq = jnp.sum(sq[:, 0:C], axis=-1)
    ph_sq = jnp.sum(sq[:, C:2 * C], axis=-1)
    sh_sq = jnp.sum(sq[:, 2 * C:3 * C], axis=-1)
    # Same divide-by-zero exposure as the PyTorch module if sh_sq underflows;
    # semantics preserved deliberately.
    scores = jnp.stack([img_sq / sh_sq, ph_sq / sh_sq], axis=-1)   # (B, 2)
    weights = jax.nn.softmax(scores, axis=-1)
    return joint, weights[:, 0], weights[:, 1]


def multimodal_attention(img_embed, ph_embed, params, packed_params=None):
    """Module-equivalent single-pair API: returns (joint (N,C), img_w, ph_w)."""
    if packed_params is None:
        packed_params = pack_mm_attention_params(params)
    joint, iw, pw = multimodal_attention_batched(
        img_embed[None], ph_embed[None], packed_params)
    return joint[0], iw[0], pw[0]


def _reference(img, ph, params):
    """Pure-JAX f32 reference mirroring the PyTorch forward."""
    w_sh, b_sh, w_img, b_img, w_ph, b_ph = params
    hp = jax.lax.Precision.HIGHEST
    shared = 0.5 * (img + ph)
    img_att = jnp.tanh(jnp.dot(img, w_img.T, precision=hp) + b_img)
    ph_att = jnp.tanh(jnp.dot(ph, w_ph.T, precision=hp) + b_ph)
    sh_att = jnp.tanh(jnp.dot(shared, w_sh.T, precision=hp) + b_sh)
    sh_sq = jnp.sum(sh_att * sh_att)
    scores = jnp.stack([jnp.sum(img_att * img_att) / sh_sq,
                        jnp.sum(ph_att * ph_att) / sh_sq])
    w = jax.nn.softmax(scores)
    joint = sh_att * shared + img_att * img + ph_att * ph
    return joint, w[0], w[1]


if __name__ == "__main__":
    N, C = 8, 32  # N samples, C = args.out channels

    key = jax.random.PRNGKey(0)
    keys = jax.random.split(key, 10)
    img_embed = jax.random.normal(keys[0], (N, C), dtype=jnp.float32)
    ph_embed = jax.random.normal(keys[1], (N, C), dtype=jnp.float32)

    # torch.nn.Linear-like uniform(-1/sqrt(C), 1/sqrt(C)) init.
    bound = 1.0 / np.sqrt(C)
    w_sh = jax.random.uniform(keys[2], (C, C), jnp.float32, -bound, bound)
    b_sh = jax.random.uniform(keys[3], (C,), jnp.float32, -bound, bound)
    w_img = jax.random.uniform(keys[4], (C, C), jnp.float32, -bound, bound)
    b_img = jax.random.uniform(keys[5], (C,), jnp.float32, -bound, bound)
    w_ph = jax.random.uniform(keys[6], (C, C), jnp.float32, -bound, bound)
    b_ph = jax.random.uniform(keys[7], (C,), jnp.float32, -bound, bound)
    params = (w_sh, b_sh, w_img, b_img, w_ph, b_ph)

    packed = pack_mm_attention_params(params)   # once per parameter update

    # --- single-pair path (module-equivalent API) ------------------------------
    joint, img_w, ph_w = multimodal_attention(img_embed, ph_embed, params, packed)
    jax.block_until_ready((joint, img_w, ph_w))

    j_ref, iw_ref, pw_ref = _reference(img_embed, ph_embed, params)
    assert np.allclose(np.asarray(joint), np.asarray(j_ref), rtol=2e-4, atol=2e-4)
    assert np.allclose(float(img_w), float(iw_ref), rtol=2e-4, atol=2e-4)
    assert np.allclose(float(ph_w), float(pw_ref), rtol=2e-4, atol=2e-4)

    # --- batched path (the structural perf lever) ------------------------------
    B = 4
    img_b = jax.random.normal(keys[8], (B, N, C), dtype=jnp.float32)
    ph_b = jax.random.normal(keys[9], (B, N, C), dtype=jnp.float32)
    joint_b, iw_b, pw_b = multimodal_attention_batched(img_b, ph_b, packed)
    jax.block_until_ready((joint_b, iw_b, pw_b))
    for i in range(B):
        jr, ir, pr = _reference(img_b[i], ph_b[i], params)
        assert np.allclose(np.asarray(joint_b[i]), np.asarray(jr),
                           rtol=2e-4, atol=2e-4)
        assert np.allclose(float(iw_b[i]), float(ir), rtol=2e-4, atol=2e-4)
        assert np.allclose(float(pw_b[i]), float(pr), rtol=2e-4, atol=2e-4)

    print("KERNEL_OK")
</pallas_src>

<mosaic_0001>
module attributes {stable_mosaic.version = 11 : i64} {
  func.func @_mm_attention_kernel(%arg0: i32, %arg1: memref<1x8x128xf32, #tpu.memory_space<vmem>>, %arg2: memref<128x128xf32, #tpu.memory_space<vmem>>, %arg3: memref<1x128xf32, #tpu.memory_space<vmem>>, %arg4: memref<1x8x128xf32, #tpu.memory_space<vmem>>, %arg5: memref<1x1x128xf32, #tpu.memory_space<vmem>>) attributes {dimension_semantics = [#tpu.dimension_semantics<parallel>], iteration_bounds = array<i64: 1>, scalar_prefetch = 0 : i64, scratch_operands = 0 : i64, tpu.core_type = #tpu.core_type<tc>, window_params = [{transform_indices = @transform_0, window_bounds = array<i64: 1, 8, 128>}, {pipeline_mode = #tpu.pipeline_mode<synchronous>, transform_indices = @transform_1, window_bounds = array<i64: 128, 128>}, {pipeline_mode = #tpu.pipeline_mode<synchronous>, transform_indices = @transform_2, window_bounds = array<i64: 1, 128>}, {transform_indices = @transform_3, window_bounds = array<i64: 1, 8, 128>}, {transform_indices = @transform_4, window_bounds = array<i64: 1, 1, 128>}]} {
    %c0 = arith.constant 0 : index
    %c0_0 = arith.constant 0 : index
    %c0_1 = arith.constant 0 : index
    %0 = vector.load %arg1[%c0, %c0_0, %c0_1] : memref<1x8x128xf32, #tpu.memory_space<vmem>>, vector<1x8x128xf32>
    %1 = vector.shape_cast %0 : vector<1x8x128xf32> to vector<8x128xf32>
    %c0_2 = arith.constant 0 : index
    %c0_3 = arith.constant 0 : index
    %2 = vector.load %arg2[%c0_2, %c0_3] : memref<128x128xf32, #tpu.memory_space<vmem>>, vector<128x128xf32>
    %cst = arith.constant dense<0.000000e+00> : vector<8x128xf32>
    %3 = tpu.matmul %1, %2, %cst {dimension_numbers = #tpu.dot_dimension_numbers<[1], [0], [0], [1], [0, 0, 1, 1], [], []>, precision = #tpu.contract_precision<fp32>} : vector<8x128xf32>, vector<128x128xf32>, vector<8x128xf32> -> vector<8x128xf32>
    %c0_4 = arith.constant 0 : index
    %c0_5 = arith.constant 0 : index
    %4 = vector.load %arg3[%c0_4, %c0_5] : memref<1x128xf32, #tpu.memory_space<vmem>>, vector<1x128xf32>
    %5 = vector.broadcast %4 : vector<1x128xf32> to vector<8x128xf32>
    %6 = arith.addf %3, %5 : vector<8x128xf32>
    %7 = math.tanh %6 : vector<8x128xf32>
    %8 = arith.mulf %7, %1 : vector<8x128xf32>
    %c96_i32 = arith.constant 96 : i32
    %9 = tpu.dynamic_rotate %8 by %c96_i32 dim 1 : vector<8x128xf32>, i32 -> vector<8x128xf32>
    %10 = arith.addf %8, %9 : vector<8x128xf32>
    %c64_i32 = arith.constant 64 : i32
    %11 = tpu.dynamic_rotate %8 by %c64_i32 dim 1 : vector<8x128xf32>, i32 -> vector<8x128xf32>
    %12 = arith.addf %10, %11 : vector<8x128xf32>
    %c0_6 = arith.constant 0 : index
    %c0_7 = arith.constant 0 : index
    %c0_8 = arith.constant 0 : index
    %13 = vector.load %arg4[%c0_6, %c0_7, %c0_8] : memref<1x8x128xf32, #tpu.memory_space<vmem>>, vector<1x8x128xf32>
    %14 = vector.shape_cast %13 : vector<1x8x128xf32> to vector<8x128xf32>
    %15 = vector.shape_cast %12 : vector<8x128xf32> to vector<1x8x128xf32>
    tpu.vector_store %arg4[%c0_6, %c0_7, %c0_8], %15 {strides = array<i32>} : memref<1x8x128xf32, #tpu.memory_space<vmem>>, vector<1x8x128xf32>,
    %16 = arith.mulf %7, %7 : vector<8x128xf32>
    %cst_9 = arith.constant dense<0.000000e+00> : vector<128xf32>
    %17 = vector.multi_reduction <add>, %16, %cst_9 [0] : vector<8x128xf32> to vector<128xf32>
    %18 = vector.shape_cast %17 : vector<128xf32> to vector<1x128xf32>
    %c0_10 = arith.constant 0 : index
    %c0_11 = arith.constant 0 : index
    %c0_12 = arith.constant 0 : index
    %19 = vector.load %arg5[%c0_10, %c0_11, %c0_12] : memref<1x1x128xf32, #tpu.memory_space<vmem>>, vector<1x1x128xf32>
    %20 = vector.shape_cast %19 : vector<1x1x128xf32> to vector<1x128xf32>
    %21 = vector.shape_cast %18 : vector<1x128xf32> to vector<1x1x128xf32>
    tpu.vector_store %arg5[%c0_10, %c0_11, %c0_12], %21 {strides = array<i32>} : memref<1x1x128xf32, #tpu.memory_space<vmem>>, vector<1x1x128xf32>,
    return
  }
  func.func @transform_0(%arg0: i32) -> (i32, i32, i32) {
    %c0_i32 = arith.constant 0 : i32
    %c0_i32_0 = arith.constant 0 : i32
    %c0_i32_1 = arith.constant 0 : i32
    return %arg0, %c0_i32, %c0_i32_0 : i32, i32, i32
  }
  func.func @transform_1(%arg0: i32) -> (i32, i32) {
    %c0_i32 = arith.constant 0 : i32
    %c0_i32_0 = arith.constant 0 : i32
    %c0_i32_1 = arith.constant 0 : i32
    return %c0_i32, %c0_i32_0 : i32, i32
  }
  func.func @transform_2(%arg0: i32) -> (i32, i32) {
    %c0_i32 = arith.constant 0 : i32
    %c0_i32_0 = arith.constant 0 : i32
    %c0_i32_1 = arith.constant 0 : i32
    return %c0_i32, %c0_i32_0 : i32, i32
  }
  func.func @transform_3(%arg0: i32) -> (i32, i32, i32) {
    %c0_i32 = arith.constant 0 : i32
    %c0_i32_0 = arith.constant 0 : i32
    %c0_i32_1 = arith.constant 0 : i32
    return %arg0, %c0_i32, %c0_i32_0 : i32, i32, i32
  }
  func.func @transform_4(%arg0: i32) -> (i32, i32, i32) {
    %c0_i32 = arith.constant 0 : i32
    %c0_i32_0 = arith.constant 0 : i32
    %c0_i32_1 = arith.constant 0 : i32
    return %arg0, %c0_i32, %c0_i32_0 : i32, i32, i32
  }
}

</mosaic_0001>

<bundles_post_ra>
// kernel: tpu_custom_call.1
= control target key start
LH: loop header
LB: loop body
LE: loop exit
PB: predicated region body
PF: predicated region fallthrough
CT: control target
= control target key end

     0   :  { %10 = vsyncpa [#allocation3], 0  ;;  %s867_s0 = inlined_call_operand.hbm [shape: f32[1,8,128], index: 0, kind: input, shape index: {}]   ;;  %s868_s1 = inlined_call_operand.hbm [shape: f32[128,128], index: 1, kind: input, shape index: {}]   ;;  %s869_s2 = inlined_call_operand.vmem [shape: f32[1,128], index: 2, kind: input, shape index: {}]   ;;  %s870_s3 = inlined_call_operand.hbm [shape: f32[1,8,128], index: 3, kind: output, shape index: {0}]   ;;  %s871_s4 = inlined_call_operand.hbm [shape: f32[1,1,128], index: 4, kind: output, shape index: {1}]  }
   0x1   :  { %11 = vsyncpa [#allocation6], 0 }
   0x2   :  { %12 = vsyncpa [#allocation4], 0 }
   0x3   :  { %13 = vsyncpa [#allocation9], 0  ;;  %s19_s17 = sshll.u32 %s867_s0, 4  ;;  %s576_s18 = smov [#allocation2]   ;;  %s20_s17 = int_to_ptr.hbm [resolvable:$true] %s19_s17 }
   0x4   :  { %s21_s19 = sshll.u32 %s576_s18, 4  ;;  %s29_s22 = sshll.u32 %s868_s1, 4  ;;  %s22_s19 = int_to_ptr.vmem [resolvable:$true] %s21_s19  ;;  %s30_s22 = int_to_ptr.hbm [resolvable:$true] %s29_s22 }
   0x5   :  { %24 = dma.hbm_to_vmem [thread:$0]  %s20_s17, 128, %s22_s19, [#allocation3]  }
   0x6   :  { %s577_s23 = smov [#allocation5]   ;;  %s578_s25 = smov 128  }
   0x7   :  { %s31_s24 = sshll.u32 %s577_s23, 4  ;;  %s579_s26 = smov 8   ;;  %s32_s24 = int_to_ptr.vmem [resolvable:$true] %s31_s24 }
   0x8   :  { %37 = dma.hbm_to_vmem [thread:$0]  %s30_s22, 2048, %s32_s24, [#allocation6], %s578_s25, %s578_s25, %s579_s26  }
   0x9   :  { %568 = dma.done.wait [#allocation3], 128  }
   0xa   :  { %569 = vsyncadd [#allocation3], 4294967168 }
   0xb   :  { %570 = dma.done.wait [#allocation6], 2048  }
   0xc   :  { %571 = vsyncadd [#allocation6], 4294965248  ;;  %v64_v0 = vld [vmem:[#allocation5 + $0x78] sm:$0xff]  ;;  %v63_v1 = vld [vmem:[#allocation5 + $0x70] sm:$0xff]  ;;  %s580_s27 = smov 96   ;;  %s445_s5 = sshll.u32 %s871_s4, 4  ;;  %s446_s5 = int_to_ptr.hbm [resolvable:$true] %s445_s5 }
   0xd   :  { %v62_v2 = vld [vmem:[#allocation5 + $0x68] sm:$0xff]  ;;  %v615_v3 = vand.u32 4294901760, %v64_v0  ;;  %v617_v4 = vand.u32 4294901760, %v63_v1  ;;  %v61_v6 = vld [vmem:[#allocation5 + $0x60] sm:$0xff]  ;;  %v60_v7 = vld [vmem:[#allocation5 + $0x58] sm:$0xff]  ;;  %s582_s6 = smov 64  }
   0xe   :  { %v619_v5 = vand.u32 4294901760, %v62_v2  ;;  %v59_v8 = vld [vmem:[#allocation5 + $0x50] sm:$0xff]  ;;  %v621_v9 = vand.u32 4294901760, %v61_v6  ;;  %v623_v10 = vand.u32 4294901760, %v60_v7  ;;  %v58_v12 = vld [vmem:[#allocation5 + $0x48] sm:$0xff]  ;;  %v57_v13 = vld [vmem:[#allocation5 + $0x40] sm:$0xff] }
   0xf   :  { %v625_v11 = vand.u32 4294901760, %v59_v8  ;;  %70 = vmatpush.msra.mxu0 %v615_v3  ;;  %v629_v14 = vsub.f32 %v64_v0, %v615_v3  ;;  %v632_v15 = vsub.f32 %v63_v1, %v617_v4  ;;  %v637_v17 = vand.u32 4294901760, %v58_v12  ;;  %266 = vmatpush.msra.mxu3 %v615_v3  ;;  %v56_v21 = vld [vmem:[#allocation5 + $0x38] sm:$0xff]  ;;  %v55_v34 = vld [vmem:[#allocation5 + $0x30] sm:$0xff]  ;;  %v54_v35 = vld [vmem:[#allocation5 + $0x28] sm:$0xff]  ;;  %s583_s7 = smov [#allocation7]  }
  0x10   :  { %v635_v16 = vsub.f32 %v62_v2, %v619_v5  ;;  %v641_v18 = vsub.f32 %v61_v6, %v621_v9  ;;  %v644_v19 = vsub.f32 %v60_v7, %v623_v10  ;;  %v646_v20 = vand.u32 4294901760, %v57_v13  ;;  %v53_v42 = vld [vmem:[#allocation5 + $0x20] sm:$0xff]  ;;  %v52_v47 = vld [vmem:[#allocation5 + $0x18] sm:$0xff]  ;;  %v51_v53 = vld [vmem:[#allocation5 + $0x10] sm:$0xff]  ;;  %s432_s8 = sshll.u32 %s583_s7, 4  ;;  %s434_s11 = sshll.u32 %s870_s3, 4  ;;  %s433_s8 = int_to_ptr.vmem [resolvable:$true] %s432_s8  ;;  %s435_s11 = int_to_ptr.hbm [resolvable:$true] %s434_s11 }
  0x11   :  { %72 = vmatpush.msra.mxu0 %v617_v4  ;;  %v112_v22 = vand.u32 4294901760, %v629_v14  ;;  %v118_v23 = vand.u32 4294901760, %v632_v15  ;;  %v653_v25 = vsub.f32 %v59_v8, %v625_v11  ;;  %213 = vmatpush.msra.mxu2 %v629_v14  ;;  %v659_v28 = vsub.f32 %v58_v12, %v637_v17  ;;  %v50_v61 = vld [vmem:[#allocation5 + $0x8] sm:$0xff]  ;;  %v49_v2 = vld [vmem:[#allocation5] sm:$0xff] }
  0x12   :  { %v124_v24 = vand.u32 4294901760, %v635_v16  ;;  %v130_v26 = vand.u32 4294901760, %v641_v18  ;;  %v136_v27 = vand.u32 4294901760, %v644_v19  ;;  %268 = vmatpush.msra.mxu3 %v617_v4  ;;  %v672_v32 = vand.u32 4294901760, %v56_v21 }
  0x13   :  { %v113_v29 = vsub.f32 %v629_v14, %v112_v22  ;;  %74 = vmatpush.msra.mxu0 %v619_v5  ;;  %v119_v30 = vsub.f32 %v632_v15, %v118_v23  ;;  %216 = vmatpush.msra.mxu2 %v632_v15  ;;  %v676_v33 = vsub.f32 %v57_v13, %v646_v20  ;;  %v142_v39 = vand.u32 4294901760, %v653_v25 }
  0x14   :  { %v125_v31 = vsub.f32 %v635_v16, %v124_v24  ;;  %270 = vmatpush.msra.mxu3 %v619_v5  ;;  %v131_v38 = vsub.f32 %v641_v18, %v130_v26  ;;  %v137_v40 = vsub.f32 %v644_v19, %v136_v27  ;;  %v148_v41 = vand.u32 4294901760, %v659_v28 }
  0x15   :  { %v114_v36 = vand.u32 4294901760, %v113_v29  ;;  %v120_v37 = vand.u32 4294901760, %v119_v30  ;;  %76 = vmatpush.msra.mxu0 %v621_v9  ;;  %219 = vmatpush.msra.mxu2 %v635_v16  ;;  %v691_v44 = vand.u32 4294901760, %v55_v34  ;;  %v694_v45 = vsub.f32 %v56_v21, %v672_v32  ;;  %v751_v29 = vld [vmem:[#allocation2] sm:$0xff] }
  0x16   :  { %272 = vmatpush.msra.mxu3 %v621_v9  ;;  %v126_v43 = vand.u32 4294901760, %v125_v31  ;;  %v696_v46 = vand.u32 4294901760, %v54_v35  ;;  %v154_v48 = vand.u32 4294901760, %v676_v33  ;;  %v132_v49 = vand.u32 4294901760, %v131_v38 }
  0x17   :  { %115 = vmatpush.msra.mxu1 %v114_v36  ;;  %78 = vmatpush.msra.mxu0 %v623_v10  ;;  %v143_v50 = vsub.f32 %v653_v25, %v142_v39  ;;  %v706_v51 = vsub.f32 %v55_v34, %v691_v44  ;;  %v708_v52 = vand.u32 4294901760, %v53_v42  ;;  %v710_v54 = vand.u32 4294901760, %v52_v47 }
  0x18   :  { %222 = vmatpush.msra.mxu2 %v641_v18  ;;  %274 = vmatpush.msra.mxu3 %v623_v10  ;;  %v138_v55 = vand.u32 4294901760, %v137_v40  ;;  %v149_v56 = vsub.f32 %v659_v28, %v148_v41  ;;  %v160_v57 = vand.u32 4294901760, %v694_v45  ;;  %v720_v58 = vsub.f32 %v54_v35, %v696_v46 }
  0x19   :  { %121 = vmatpush.msra.mxu1 %v120_v37  ;;  %80 = vmatpush.msra.mxu0 %v625_v11  ;;  %v155_v59 = vsub.f32 %v676_v33, %v154_v48  ;;  %v725_v60 = vand.u32 4294901760, %v51_v53  ;;  %v144_v62 = vand.u32 4294901760, %v143_v50  ;;  %v166_v63 = vand.u32 4294901760, %v706_v51 }
  0x1a   :  { %225 = vmatpush.msra.mxu2 %v644_v19  ;;  %276 = vmatpush.msra.mxu3 %v625_v11  ;;  %v732_v0 = vsub.f32 %v53_v42, %v708_v52  ;;  %v735_v1 = vsub.f32 %v52_v47, %v710_v54  ;;  %v150_v6 = vand.u32 4294901760, %v149_v56  ;;  %v161_v7 = vsub.f32 %v694_v45, %v160_v57 }
  0x1b   :  { %127 = vmatpush.msra.mxu1 %v126_v43  ;;  %82 = vmatpush.msra.mxu0 %v637_v17  ;;  %v172_v8 = vand.u32 4294901760, %v720_v58  ;;  %v744_v12 = vand.u32 4294901760, %v50_v61  ;;  %v156_v13 = vand.u32 4294901760, %v155_v59  ;;  %v747_v21 = vsub.f32 %v51_v53, %v725_v60 }
  0x1c   :  { %228 = vmatpush.msra.mxu2 %v653_v25  ;;  %278 = vmatpush.msra.mxu3 %v637_v17  ;;  %v167_v30 = vsub.f32 %v706_v51, %v166_v63  ;;  %v178_v31 = vand.u32 4294901760, %v732_v0  ;;  %v758_v34 = vand.u32 4294901760, %v49_v2  ;;  %v761_v35 = vand.u32 4294901760, %v751_v29 }
  0x1d   :  { %133 = vmatpush.msra.mxu1 %v132_v49  ;;  %84 = vmatpush.msra.mxu0 %v646_v20  ;;  %v184_v36 = vand.u32 4294901760, %v735_v1  ;;  %v162_v37 = vand.u32 4294901760, %v161_v7  ;;  %v173_v38 = vsub.f32 %v720_v58, %v172_v8  ;;  %v771_v40 = vsub.f32 %v50_v61, %v744_v12 }
  0x1e   :  { %231 = vmatpush.msra.mxu2 %v659_v28  ;;  %280 = vmatpush.msra.mxu3 %v646_v20  ;;  %v102_v42 = vsub.f32 %v751_v29, %v761_v35  ;;  %v168_v43 = vand.u32 4294901760, %v167_v30  ;;  %v179_v47 = vsub.f32 %v732_v0, %v178_v31  ;;  %v190_v49 = vand.u32 4294901760, %v747_v21 }
  0x1f   :  { %139 = vmatpush.msra.mxu1 %v138_v55  ;;  %86 = vmatpush.msra.mxu0 %v672_v32  ;;  %v783_v50 = vsub.f32 %v49_v2, %v758_v34  ;;  %v174_v53 = vand.u32 4294901760, %v173_v38  ;;  %v185_v55 = vsub.f32 %v735_v1, %v184_v36  ;;  %v196_v56 = vand.u32 4294901760, %v771_v40 }
  0x20   :  { %234 = vmatpush.msra.mxu2 %v676_v33  ;;  %282 = vmatpush.msra.mxu3 %v672_v32  ;;  %v103_v59 = vand.u32 4294901760, %v102_v42  ;;  %v180_v61 = vand.u32 4294901760, %v179_v47 }
  0x21   :  { %145 = vmatpush.msra.mxu1 %v144_v62  ;;  %88 = vmatpush.msra.mxu0 %v691_v44  ;;  %v191_v62 = vsub.f32 %v747_v21, %v190_v49  ;;  %v202_v2 = vand.u32 4294901760, %v783_v50  ;;  %v197_v7 = vsub.f32 %v771_v40, %v196_v56 }
  0x22   :  { %237 = vmatpush.msra.mxu2 %v694_v45  ;;  %284 = vmatpush.msra.mxu3 %v691_v44 }
  0x23   :  { %151 = vmatpush.msra.mxu1 %v150_v6  ;;  %90 = vmatpush.msra.mxu0 %v696_v46  ;;  %v186_v6 = vand.u32 4294901760, %v185_v55  ;;  %v192_v30 = vand.u32 4294901760, %v191_v62  ;;  %v198_v38 = vand.u32 4294901760, %v197_v7 }
  0x24   :  { %240 = vmatpush.msra.mxu2 %v706_v51  ;;  %286 = vmatpush.msra.mxu3 %v696_v46 }
  0x25   :  { %157 = vmatpush.msra.mxu1 %v156_v13  ;;  %92 = vmatpush.msra.mxu0 %v708_v52  ;;  %v104_v13 = vsub.f32 %v102_v42, %v103_v59 }
  0x26   :  { %243 = vmatpush.msra.mxu2 %v720_v58  ;;  %288 = vmatpush.msra.mxu3 %v708_v52 }
  0x27   :  { %163 = vmatpush.msra.mxu1 %v162_v37  ;;  %94 = vmatpush.msra.mxu0 %v710_v54  ;;  %v203_v37 = vsub.f32 %v783_v50, %v202_v2 }
  0x28   :  { %246 = vmatpush.msra.mxu2 %v732_v0  ;;  %290 = vmatpush.msra.mxu3 %v710_v54 }
  0x29   :  { %169 = vmatpush.msra.mxu1 %v168_v43  ;;  %96 = vmatpush.msra.mxu0 %v725_v60  ;;  %v105_v43 = vand.u32 4294901760, %v104_v13  ;;  %v204_v47 = vand.u32 4294901760, %v203_v37 }
  0x2a   :  { %249 = vmatpush.msra.mxu2 %v735_v1  ;;  %292 = vmatpush.msra.mxu3 %v725_v60 }
  0x2b   :  { %175 = vmatpush.msra.mxu1 %v174_v53  ;;  %98 = vmatpush.msra.mxu0 %v744_v12 }
  0x2c   :  { %252 = vmatpush.msra.mxu2 %v747_v21  ;;  %294 = vmatpush.msra.mxu3 %v744_v12 }
  0x2d   :  { %181 = vmatpush.msra.mxu1 %v180_v61  ;;  %100 = vmatpush.msra.mxu0 %v758_v34 }
  0x2e   :  { %255 = vmatpush.msra.mxu2 %v771_v40  ;;  %296 = vmatpush.msra.mxu3 %v758_v34 }
  0x2f   :  { %307 = vmatpush.msrb.mxu0 %v112_v22  ;;  %187 = vmatpush.msra.mxu1 %v186_v6 }
  0x30   :  { %258 = vmatpush.msra.mxu2 %v783_v50  ;;  %300 = vmatmul.f32.vlgmr.msra.gmra.mxu3 %v103_v59 }
  0x31   :  { %311 = vmatpush.msrb.mxu0 %v118_v23  ;;  %193 = vmatpush.msra.mxu1 %v192_v30 }
  0x32   :  { %261 = vmatmul.f32.vlgmr.msra.gmra.mxu2 %v102_v42  ;;  %106 = vmatmul.f32.vlgmr.msra.gmra.mxu0 %v105_v43 }
  0x33   :  { %315 = vmatpush.msrb.mxu0 %v124_v24  ;;  %199 = vmatpush.msra.mxu1 %v198_v38 }
  0x35   :  { %319 = vmatpush.msrb.mxu0 %v130_v26  ;;  %205 = vmatpush.msra.mxu1 %v204_v47 }
  0x36   :  { %207 = vmatmul.f32.vlgmr.msra.gmra.mxu1 %v761_v35 }
  0x37   :  { %374 = vmatpush.msrb.mxu1 %v615_v3  ;;  %323 = vmatpush.msrb.mxu0 %v136_v27  ;;  %v469_v3 = vld [vmem:[%s869_s2] ss:$0 sm:$0xff]  ;;  %s581_s2 = smov [#allocation8]  }
  0x38   :  { %s443_s28 = sshll.u32 %s581_s2, 4  ;;  %s444_s28 = int_to_ptr.vmem [resolvable:$true] %s443_s28 }
  0x39   :  { %376 = vmatpush.msrb.mxu1 %v617_v4  ;;  %327 = vmatpush.msrb.mxu0 %v142_v39 }
  0x3b   :  { %378 = vmatpush.msrb.mxu1 %v619_v5  ;;  %331 = vmatpush.msrb.mxu0 %v148_v41 }
  0x3d   :  { %380 = vmatpush.msrb.mxu1 %v621_v9  ;;  %335 = vmatpush.msrb.mxu0 %v154_v48 }
  0x3f   :  { %382 = vmatpush.msrb.mxu1 %v623_v10  ;;  %339 = vmatpush.msrb.mxu0 %v160_v57 }
  0x41   :  { %384 = vmatpush.msrb.mxu1 %v625_v11  ;;  %343 = vmatpush.msrb.mxu0 %v166_v63 }
  0x43   :  { %386 = vmatpush.msrb.mxu1 %v637_v17  ;;  %347 = vmatpush.msrb.mxu0 %v172_v8 }
  0x45   :  { %388 = vmatpush.msrb.mxu1 %v646_v20  ;;  %351 = vmatpush.msrb.mxu0 %v178_v31 }
  0x47   :  { %390 = vmatpush.msrb.mxu1 %v672_v32  ;;  %355 = vmatpush.msrb.mxu0 %v184_v36 }
  0x49   :  { %392 = vmatpush.msrb.mxu1 %v691_v44  ;;  %359 = vmatpush.msrb.mxu0 %v190_v49 }
  0x4b   :  { %394 = vmatpush.msrb.mxu1 %v696_v46  ;;  %363 = vmatpush.msrb.mxu0 %v196_v56 }
  0x4d   :  { %396 = vmatpush.msrb.mxu1 %v708_v52  ;;  %367 = vmatpush.msrb.mxu0 %v202_v2 }
  0x4e   :  { %369 = vmatmul.f32.vlgmr.msrb.gmra.mxu0 %v761_v35 }
  0x4f   :  { %398 = vmatpush.msrb.mxu1 %v710_v54 }
  0x51   :  { %400 = vmatpush.msrb.mxu1 %v725_v60 }
  0x53   :  { %402 = vmatpush.msrb.mxu1 %v744_v12 }
  0x55   :  { %404 = vmatpush.msrb.mxu1 %v758_v34 }
  0x56   :  { %406 = vmatmul.f32.vlgmr.msrb.gmra.mxu1 %v761_v35 }
  0xaf   :  { %v107_v4 = vpop.f32.mrf.mxu0 }
  0xb0   :  { %v108_v5 = vadd.f32 %v469_v3, %v107_v4 }
  0xb3   :  { %v208_v9 = vpop.f32.mrf.mxu1  ;;  %v301_v15 = vpop.f32.mrf.mxu3 }
  0xb4   :  { %v209_v10 = vadd.f32 %v208_v9, %v108_v5 }
  0xb5   :  { %v262_v11 = vpop.f32.mrf.mxu2 }
  0xb6   :  { %v263_v14 = vadd.f32 %v262_v11, %v209_v10 }
  0xb8   :  { %v302_v16 = vadd.f32 %v301_v15, %v263_v14 }
  0xcb   :  { %v370_v17 = vpop.f32.mrf.mxu0 }
  0xcc   :  { %v371_v18 = vadd.f32 %v370_v17, %v302_v16 }
  0xd3   :  { %v407_v19 = vpop.f32.mrf.mxu1 }
  0xd4   :  { %v408_v20 = vadd.f32 %v407_v19, %v371_v18 }
  0xd6   :  { %470 = vtanh.f32 %v408_v20 }
  0xdc   :  { %v471_v22 = vpop.eup %470 }
  0xdd   :  { %v419_v23 = vmul.f32 %v471_v22, %v471_v22  ;;  %v411_v24 = vmul.f32 %v471_v22, %v751_v29 }
  0xdf   :  { %v420_v25 = vrot.slane %v419_v23, 4  ;;  %412 = vrot.lane.b32.xlu0 %v411_v24, %s580_s27 }
  0xe1   :  { %v421_v26 = vadd.f32 %v420_v25, %v419_v23 }
  0xe3   :  { %v422_v27 = vrot.slane %v421_v26, 2 }
  0xe5   :  { %v423_v28 = vadd.f32 %v422_v27, %v421_v26 }
  0xe7   :  { %415 = vrot.lane.b32.xlu0 %v411_v24, %s582_s6  ;;  %v424_v32 = vrot.slane %v423_v28, 1 }
  0xe9   :  { %v425_v33 = vadd.f32 %v424_v32, %v423_v28 }
  0xeb   :  { %426 = vst [vmem:[#allocation8] sm:$0x1] %v425_v33 }
  0xec   :  { %448 = dma.vmem_to_hbm [thread:$0]  %s444_s28, 16, %s446_s5, [#allocation9]  }
 0x151   :  { %v413_v39 = vpop.permute.xlu0 %412 }
 0x152   :  { %v414_v41 = vadd.f32 %v413_v39, %v411_v24 }
 0x159   :  { %v416_v44 = vpop.permute.xlu0 %415 }
 0x15a   :  { %v417_v45 = vadd.f32 %v416_v44, %v414_v41 }
 0x15c   :  { %418 = vst [vmem:[#allocation7] sm:$0xff] %v417_v45 }
 0x15d   :  { %437 = dma.vmem_to_hbm [thread:$0]  %s433_s8, 128, %s435_s11, [#allocation4]  }
 0x15e   :  { %572 = dma.done.wait [#allocation4], 128  }
 0x15f   :  { %573 = vsyncadd [#allocation4], 4294967168 }
 0x160   :  { %574 = dma.done.wait [#allocation9], 16  }
 0x161   :  { %575 = vsyncadd [#allocation9], 4294967280 }
 0x162   :  { %457 = vsyncpa [#allocation3], 1 }
 0x163   :  { %458 = vsyncpa [#allocation6], 1 }
 0x164   :  { %459 = vsyncpa [#allocation4], 1 }
 0x165   :  { %460 = vsyncpa [#allocation9], 1 }

</bundles_post_ra>
